<compile_context>
chip_gen: v7x
topology: tpu7x:2x2x1
jax: 0.10.0
libtpu: 0.0.40
codegen_flags: <defaults>
</compile_context>

<pallas_src>
import numpy as np
import jax
import jax.numpy as jnp
from jax import lax
from jax.experimental import pallas as pl
from jax.experimental.pallas import tpu as pltpu

MARGIN = 0.5
EPS = 1e-8                       # F.cosine_similarity default eps

# Rows of the per-lane running-stats slab.
_POS_SUM, _POS_CNT, _NEG_SUM, _NEG_CNT, _POS_MAX, _NEG_MIN = range(6)


def _vmem_capacity_bytes():
    try:
        return int(pltpu.get_tpu_info().vmem_capacity_bytes)
    except Exception:
        return 64 << 20          # conservative fallback (v7x per-core VMEM)


def _online_contrastive_kernel(x_ref, y_ref, lab_ref, out_ref,
                               posd_scr, negd_scr, stat_ref):
    i = pl.program_id(0)
    tm = stat_ref.shape[1]

    @pl.when(i == 0)
    def _init():
        stat_ref[...] = jnp.zeros(stat_ref.shape, jnp.float32)
        stat_ref[_POS_MAX:_POS_MAX + 1, :] = jnp.full((1, tm), -jnp.inf, jnp.float32)
        stat_ref[_NEG_MIN:_NEG_MIN + 1, :] = jnp.full((1, tm), jnp.inf, jnp.float32)

    x = x_ref[...].astype(jnp.float32)      # (TM, D)
    y = y_ref[...].astype(jnp.float32)      # (TM, D)

    # Per-row cosine distance: 1 - x.y / (max(||x||, eps) * max(||y||, eps)).
    dot = jnp.sum(x * y, axis=-1)           # (TM,)
    nxx = jnp.sum(x * x, axis=-1)
    nyy = jnp.sum(y * y, axis=-1)
    eps2 = jnp.float32(EPS * EPS)
    # Single fused rsqrt on the EUP instead of two rsqrts / sqrt + divide.
    inv_norm = lax.rsqrt(jnp.maximum(nxx, eps2) * jnp.maximum(nyy, eps2))
    d_row = (1.0 - dot * inv_norm)[None, :]  # (1, TM), lane-dense

    lab_row = lab_ref[pl.ds(i, 1), :]        # (1, TM) int32; -1 marks padding
    pos = lab_row == 1
    neg = lab_row == 0
    pos_d = jnp.where(pos, d_row, -jnp.inf)
    neg_d = jnp.where(neg, d_row, jnp.inf)

    # Pre-masked distance slabs (padding/other-class rows become +/- inf).
    posd_scr[pl.ds(i, 1), :] = pos_d
    negd_scr[pl.ds(i, 1), :] = neg_d

    # Per-lane running statistics, accumulated under the HBM stream.
    stat_ref[_POS_SUM:_POS_SUM + 1, :] += jnp.where(pos, d_row, 0.0)
    stat_ref[_POS_CNT:_POS_CNT + 1, :] += pos.astype(jnp.float32)
    stat_ref[_NEG_SUM:_NEG_SUM + 1, :] += jnp.where(neg, d_row, 0.0)
    stat_ref[_NEG_CNT:_NEG_CNT + 1, :] += neg.astype(jnp.float32)
    stat_ref[_POS_MAX:_POS_MAX + 1, :] = jnp.maximum(
        stat_ref[_POS_MAX:_POS_MAX + 1, :], pos_d)
    stat_ref[_NEG_MIN:_NEG_MIN + 1, :] = jnp.minimum(
        stat_ref[_NEG_MIN:_NEG_MIN + 1, :], neg_d)

    # Finalize once every row tile has been processed (sequential grid axis).
    @pl.when(i == pl.num_programs(0) - 1)
    def _finalize():
        stats = stat_ref[...]                        # (8, TM)
        pos_sum = jnp.sum(stats[_POS_SUM:_POS_SUM + 1, :])
        pos_cnt = jnp.sum(stats[_POS_CNT:_POS_CNT + 1, :])
        neg_sum = jnp.sum(stats[_NEG_SUM:_NEG_SUM + 1, :])
        neg_cnt = jnp.sum(stats[_NEG_CNT:_NEG_CNT + 1, :])
        pos_max = jnp.max(stats[_POS_MAX:_POS_MAX + 1, :])
        neg_min = jnp.min(stats[_NEG_MIN:_NEG_MIN + 1, :])

        # torch returns NaN for the mean of an empty selection; we guard the
        # divide instead (differs only in the degenerate all-pos/all-neg case).
        pos_mean = pos_sum / jnp.maximum(pos_cnt, 1.0)
        neg_mean = neg_sum / jnp.maximum(neg_cnt, 1.0)

        # negative_pairs = negs[negs < (poss.max() if len(poss) > 1 else negs.mean())]
        thr_neg = jnp.where(pos_cnt > 1.0, pos_max, neg_mean)
        # positive_pairs = poss[poss > (negs.min() if len(negs) > 1 else poss.mean())]
        thr_pos = jnp.where(neg_cnt > 1.0, neg_min, pos_mean)

        pos_all = posd_scr[...]                      # (num_tiles, TM)
        neg_all = negd_scr[...]
        positive_loss = jnp.sum(jnp.where(pos_all > thr_pos, pos_all * pos_all, 0.0))
        hinge = jnp.maximum(jnp.float32(MARGIN) - neg_all, 0.0)
        negative_loss = jnp.sum(jnp.where(neg_all < thr_neg, hinge * hinge, 0.0))

        out_ref[0, 0] = positive_loss + negative_loss


def online_contrastive_loss(x, y, labels, block_rows=None):
    """OnlineContrastiveLoss forward (cosine distance, margin=0.5, sum).

    x, y may be f32 or bf16; they are upcast to f32 per tile inside the
    kernel, so bf16 inputs halve the HBM traffic of this mem-bound op.
    """
    n, dim = x.shape
    in_bytes = jnp.dtype(x.dtype).itemsize

    # Generation-aware VMEM budget.
    cap = _vmem_capacity_bytes()
    vmem_limit = max(int(min(cap * 0.85, cap - (8 << 20))), 16 << 20)
    target_block = (8 << 20) if cap >= (96 << 20) else (4 << 20)

    n8 = -(-n // 8) * 8
    if block_rows is None:
        tm = max(8, (target_block // max(1, dim * in_bytes)) // 8 * 8)
        tm = min(tm, n8)
        # Shrink tm so (2 inputs x 2 pipeline buffers) + resident slabs fit.
        slab_bytes = 16 * (n8 + tm) + 8 * tm * 4   # 2 f32 slabs + labels(x2) + stats
        input_budget = vmem_limit - slab_bytes - (2 << 20)
        tm_cap = max(8, (input_budget // max(1, 4 * dim * in_bytes)) // 8 * 8)
        tm = min(tm, tm_cap)
    else:
        assert block_rows % 8 == 0, "block_rows must be a multiple of 8"
        tm = block_rows
    num_tiles = -(-n // tm)
    n_pad = num_tiles * tm

    if n_pad != n:
        # Zero-pad embeddings; padded rows are excluded through label == -1.
        x = jnp.pad(x, ((0, n_pad - n), (0, 0)))
        y = jnp.pad(y, ((0, n_pad - n), (0, 0)))
    lab = jnp.full((n_pad,), -1, dtype=jnp.int32).at[:n].set(labels.astype(jnp.int32))
    lab = lab.reshape(num_tiles, tm)        # lane-dense, resident in VMEM

    grid_spec = pltpu.PrefetchScalarGridSpec(
        num_scalar_prefetch=0,
        grid=(num_tiles,),
        in_specs=[
            pl.BlockSpec((tm, dim), lambda i: (i, 0)),              # x tile
            pl.BlockSpec((tm, dim), lambda i: (i, 0)),              # y tile
            pl.BlockSpec((num_tiles, tm), lambda i: (0, 0)),        # labels (resident)
        ],
        out_specs=pl.BlockSpec((1, 1), lambda i: (0, 0),
                               memory_space=pltpu.MemorySpace.SMEM),
        scratch_shapes=[
            pltpu.VMEM((num_tiles, tm), jnp.float32),   # where(pos, d, -inf)
            pltpu.VMEM((num_tiles, tm), jnp.float32),   # where(neg, d, +inf)
            pltpu.VMEM((8, tm), jnp.float32),           # running stats
        ],
    )

    cost = pl.CostEstimate(
        flops=int(8 * n_pad * dim + 48 * n_pad),
        transcendentals=int(n_pad),
        bytes_accessed=int(2 * n_pad * dim * in_bytes + n_pad * 4 + 4),
    )

    out = pl.pallas_call(
        _online_contrastive_kernel,
        out_shape=jax.ShapeDtypeStruct((1, 1), jnp.float32),
        grid_spec=grid_spec,
        compiler_params=pltpu.CompilerParams(
            dimension_semantics=("arbitrary",),   # finalize needs all tiles
            vmem_limit_bytes=vmem_limit,
        ),
        cost_estimate=cost,
    )(x, y, lab)
    return out[0, 0]


def reference_loss(x, y, labels, margin=MARGIN):
    x = np.asarray(x, np.float64)
    y = np.asarray(y, np.float64)
    labels = np.asarray(labels)
    dot = (x * y).sum(-1)
    nx = np.sqrt((x * x).sum(-1))
    ny = np.sqrt((y * y).sum(-1))
    cos = dot / (np.maximum(nx, EPS) * np.maximum(ny, EPS))
    d = 1.0 - cos
    negs = d[labels == 0]
    poss = d[labels == 1]
    neg_thr = poss.max() if len(poss) > 1 else negs.mean()
    pos_thr = negs.min() if len(negs) > 1 else poss.mean()
    negative_pairs = negs[negs < neg_thr]
    positive_pairs = poss[poss > pos_thr]
    pos_loss = (positive_pairs ** 2).sum()
    neg_loss = (np.maximum(margin - negative_pairs, 0.0) ** 2).sum()
    return np.float32(pos_loss + neg_loss)


if __name__ == "__main__":
    key = jax.random.PRNGKey(0)
    k1, k2, k3, k4 = jax.random.split(key, 4)

    # Small single-tile case (matches the module's expected usage).
    N, D = 8, 32
    x = jax.random.normal(k1, (N, D), dtype=jnp.float32)
    y = jax.random.normal(k2, (N, D), dtype=jnp.float32)
    labels = jnp.array([0, 1, 0, 1, 1, 0, 1, 0], dtype=jnp.int32)

    loss = online_contrastive_loss(x, y, labels)
    jax.block_until_ready(loss)
    ref = reference_loss(np.asarray(x), np.asarray(y), np.asarray(labels))
    assert np.allclose(np.asarray(loss), ref, rtol=1e-4, atol=1e-4), (loss, ref)

    # Multi-tile + ragged-tail case (exercises tiling, padding mask, finalize).
    N2, D2 = 40, 32
    x2 = jax.random.normal(k3, (N2, D2), dtype=jnp.float32)
    y2 = jax.random.normal(k4, (N2, D2), dtype=jnp.float32)
    labels2 = jnp.asarray((np.arange(N2) % 3 == 0).astype(np.int32))

    loss2 = online_contrastive_loss(x2, y2, labels2, block_rows=16)
    jax.block_until_ready(loss2)
    ref2 = reference_loss(np.asarray(x2), np.asarray(y2), np.asarray(labels2))
    assert np.allclose(np.asarray(loss2), ref2, rtol=1e-4, atol=1e-4), (loss2, ref2)

    print("KERNEL_OK")
</pallas_src>

<mosaic_0001>
module attributes {stable_mosaic.version = 11 : i64} {
  func.func @_online_contrastive_kernel(%arg0: i32, %arg1: memref<8x32xf32, #tpu.memory_space<vmem>>, %arg2: memref<8x32xf32, #tpu.memory_space<vmem>>, %arg3: memref<1x8xi32, #tpu.memory_space<vmem>>, %arg4: memref<1x1xf32, #tpu.memory_space<smem>>, %arg5: memref<1x8xf32, #tpu.memory_space<vmem>>, %arg6: memref<1x8xf32, #tpu.memory_space<vmem>>, %arg7: memref<8x8xf32, #tpu.memory_space<vmem>>) attributes {dimension_semantics = [#tpu.dimension_semantics<arbitrary>], iteration_bounds = array<i64: 1>, scalar_prefetch = 0 : i64, scratch_operands = 3 : i64, tpu.core_type = #tpu.core_type<tc>, window_params = [{transform_indices = @transform_0, window_bounds = array<i64: 8, 32>}, {transform_indices = @transform_1, window_bounds = array<i64: 8, 32>}, {pipeline_mode = #tpu.pipeline_mode<synchronous>, transform_indices = @transform_2, window_bounds = array<i64: 1, 8>}, {transform_indices = @transform_3, window_bounds = array<i64: 1, 1>}]} {
    %c0_i32 = arith.constant 0 : i32
    %0 = arith.cmpi eq, %arg0, %c0_i32 : i32
    %1 = arith.extui %0 : i1 to i32
    %c0_i32_0 = arith.constant 0 : i32
    %2 = arith.cmpi ne, %1, %c0_i32_0 : i32
    scf.if %2 {
      %cst_38 = arith.constant 0.000000e+00 : f32
      %64 = vector.broadcast %cst_38 : f32 to vector<8x8xf32>
      %c0_39 = arith.constant 0 : index
      %c0_40 = arith.constant 0 : index
      %65 = vector.load %arg7[%c0_39, %c0_40] : memref<8x8xf32, #tpu.memory_space<vmem>>, vector<8x8xf32>
      tpu.vector_store %arg7[%c0_39, %c0_40], %64 {strides = array<i32>} : memref<8x8xf32, #tpu.memory_space<vmem>>, vector<8x8xf32>,
      %cst_41 = arith.constant 0xFF800000 : f32
      %66 = vector.broadcast %cst_41 : f32 to vector<1x8xf32>
      %c4_42 = arith.constant 4 : index
      %c0_43 = arith.constant 0 : index
      %67 = vector.load %arg7[%c4_42, %c0_43] : memref<8x8xf32, #tpu.memory_space<vmem>>, vector<1x8xf32>
      tpu.vector_store %arg7[%c4_42, %c0_43], %66 {strides = array<i32>} : memref<8x8xf32, #tpu.memory_space<vmem>>, vector<1x8xf32>,
      %cst_44 = arith.constant 0x7F800000 : f32
      %68 = vector.broadcast %cst_44 : f32 to vector<1x8xf32>
      %c5_45 = arith.constant 5 : index
      %c0_46 = arith.constant 0 : index
      %69 = vector.load %arg7[%c5_45, %c0_46] : memref<8x8xf32, #tpu.memory_space<vmem>>, vector<1x8xf32>
      tpu.vector_store %arg7[%c5_45, %c0_46], %68 {strides = array<i32>} : memref<8x8xf32, #tpu.memory_space<vmem>>, vector<1x8xf32>,
    } else {
    }
    %c0 = arith.constant 0 : index
    %c0_1 = arith.constant 0 : index
    %3 = vector.load %arg1[%c0, %c0_1] : memref<8x32xf32, #tpu.memory_space<vmem>>, vector<8x32xf32>
    %c0_2 = arith.constant 0 : index
    %c0_3 = arith.constant 0 : index
    %4 = vector.load %arg2[%c0_2, %c0_3] : memref<8x32xf32, #tpu.memory_space<vmem>>, vector<8x32xf32>
    %5 = arith.mulf %3, %4 : vector<8x32xf32>
    %cst = arith.constant dense<0.000000e+00> : vector<8xf32>
    %6 = vector.multi_reduction <add>, %5, %cst [1] : vector<8x32xf32> to vector<8xf32>
    %7 = arith.mulf %3, %3 : vector<8x32xf32>
    %cst_4 = arith.constant dense<0.000000e+00> : vector<8xf32>
    %8 = vector.multi_reduction <add>, %7, %cst_4 [1] : vector<8x32xf32> to vector<8xf32>
    %9 = arith.mulf %4, %4 : vector<8x32xf32>
    %cst_5 = arith.constant dense<0.000000e+00> : vector<8xf32>
    %10 = vector.multi_reduction <add>, %9, %cst_5 [1] : vector<8x32xf32> to vector<8xf32>
    %cst_6 = arith.constant 1.000000e-16 : f32
    %11 = vector.broadcast %cst_6 : f32 to vector<8xf32>
    %12 = arith.maximumf %8, %11 : vector<8xf32>
    %cst_7 = arith.constant 1.000000e-16 : f32
    %13 = vector.broadcast %cst_7 : f32 to vector<8xf32>
    %14 = arith.maximumf %10, %13 : vector<8xf32>
    %15 = arith.mulf %12, %14 : vector<8xf32>
    %16 = math.rsqrt %15 : vector<8xf32>
    %17 = arith.mulf %6, %16 : vector<8xf32>
    %cst_8 = arith.constant 1.000000e+00 : f32
    %18 = vector.broadcast %cst_8 : f32 to vector<8xf32>
    %19 = arith.subf %18, %17 : vector<8xf32>
    %20 = vector.shape_cast %19 : vector<8xf32> to vector<1x8xf32>
    %21 = arith.index_cast %arg0 : i32 to index
    %c0_9 = arith.constant 0 : index
    %22 = vector.load %arg3[%21, %c0_9] : memref<1x8xi32, #tpu.memory_space<vmem>>, vector<1x8xi32>
    %c1_i32 = arith.constant 1 : i32
    %23 = vector.broadcast %c1_i32 : i32 to vector<1x8xi32>
    %24 = arith.cmpi eq, %22, %23 : vector<1x8xi32>
    %c0_i32_10 = arith.constant 0 : i32
    %25 = vector.broadcast %c0_i32_10 : i32 to vector<1x8xi32>
    %26 = arith.cmpi eq, %22, %25 : vector<1x8xi32>
    %cst_11 = arith.constant 0xFF800000 : f32
    %27 = vector.broadcast %cst_11 : f32 to vector<1x8xf32>
    %28 = arith.select %24, %20, %27 : vector<1x8xi1>, vector<1x8xf32>
    %cst_12 = arith.constant 0x7F800000 : f32
    %29 = vector.broadcast %cst_12 : f32 to vector<1x8xf32>
    %30 = arith.select %26, %20, %29 : vector<1x8xi1>, vector<1x8xf32>
    %31 = arith.index_cast %arg0 : i32 to index
    %c0_13 = arith.constant 0 : index
    %32 = vector.load %arg5[%31, %c0_13] : memref<1x8xf32, #tpu.memory_space<vmem>>, vector<1x8xf32>
    tpu.vector_store %arg5[%31, %c0_13], %28 {strides = array<i32>} : memref<1x8xf32, #tpu.memory_space<vmem>>, vector<1x8xf32>,
    %33 = arith.index_cast %arg0 : i32 to index
    %c0_14 = arith.constant 0 : index
    %34 = vector.load %arg6[%33, %c0_14] : memref<1x8xf32, #tpu.memory_space<vmem>>, vector<1x8xf32>
    tpu.vector_store %arg6[%33, %c0_14], %30 {strides = array<i32>} : memref<1x8xf32, #tpu.memory_space<vmem>>, vector<1x8xf32>,
    %c0_15 = arith.constant 0 : index
    %c0_16 = arith.constant 0 : index
    %35 = vector.load %arg7[%c0_15, %c0_16] : memref<8x8xf32, #tpu.memory_space<vmem>>, vector<1x8xf32>
    %cst_17 = arith.constant 0.000000e+00 : f32
    %36 = vector.broadcast %cst_17 : f32 to vector<1x8xf32>
    %37 = arith.select %24, %20, %36 : vector<1x8xi1>, vector<1x8xf32>
    %38 = arith.addf %35, %37 : vector<1x8xf32>
    %c0_18 = arith.constant 0 : index
    %c0_19 = arith.constant 0 : index
    %39 = vector.load %arg7[%c0_18, %c0_19] : memref<8x8xf32, #tpu.memory_space<vmem>>, vector<1x8xf32>
    tpu.vector_store %arg7[%c0_18, %c0_19], %38 {strides = array<i32>} : memref<8x8xf32, #tpu.memory_space<vmem>>, vector<1x8xf32>,
    %c1 = arith.constant 1 : index
    %c0_20 = arith.constant 0 : index
    %40 = vector.load %arg7[%c1, %c0_20] : memref<8x8xf32, #tpu.memory_space<vmem>>, vector<1x8xf32>
    %41 = arith.extui %24 : vector<1x8xi1> to vector<1x8xi32>
    %42 = arith.sitofp %41 : vector<1x8xi32> to vector<1x8xf32>
    %43 = arith.addf %40, %42 : vector<1x8xf32>
    %c1_21 = arith.constant 1 : index
    %c0_22 = arith.constant 0 : index
    %44 = vector.load %arg7[%c1_21, %c0_22] : memref<8x8xf32, #tpu.memory_space<vmem>>, vector<1x8xf32>
    tpu.vector_store %arg7[%c1_21, %c0_22], %43 {strides = array<i32>} : memref<8x8xf32, #tpu.memory_space<vmem>>, vector<1x8xf32>,
    %c2 = arith.constant 2 : index
    %c0_23 = arith.constant 0 : index
    %45 = vector.load %arg7[%c2, %c0_23] : memref<8x8xf32, #tpu.memory_space<vmem>>, vector<1x8xf32>
    %cst_24 = arith.constant 0.000000e+00 : f32
    %46 = vector.broadcast %cst_24 : f32 to vector<1x8xf32>
    %47 = arith.select %26, %20, %46 : vector<1x8xi1>, vector<1x8xf32>
    %48 = arith.addf %45, %47 : vector<1x8xf32>
    %c2_25 = arith.constant 2 : index
    %c0_26 = arith.constant 0 : index
    %49 = vector.load %arg7[%c2_25, %c0_26] : memref<8x8xf32, #tpu.memory_space<vmem>>, vector<1x8xf32>
    tpu.vector_store %arg7[%c2_25, %c0_26], %48 {strides = array<i32>} : memref<8x8xf32, #tpu.memory_space<vmem>>, vector<1x8xf32>,
    %c3 = arith.constant 3 : index
    %c0_27 = arith.constant 0 : index
    %50 = vector.load %arg7[%c3, %c0_27] : memref<8x8xf32, #tpu.memory_space<vmem>>, vector<1x8xf32>
    %51 = arith.extui %26 : vector<1x8xi1> to vector<1x8xi32>
    %52 = arith.sitofp %51 : vector<1x8xi32> to vector<1x8xf32>
    %53 = arith.addf %50, %52 : vector<1x8xf32>
    %c3_28 = arith.constant 3 : index
    %c0_29 = arith.constant 0 : index
    %54 = vector.load %arg7[%c3_28, %c0_29] : memref<8x8xf32, #tpu.memory_space<vmem>>, vector<1x8xf32>
    tpu.vector_store %arg7[%c3_28, %c0_29], %53 {strides = array<i32>} : memref<8x8xf32, #tpu.memory_space<vmem>>, vector<1x8xf32>,
    %c4 = arith.constant 4 : index
    %c0_30 = arith.constant 0 : index
    %55 = vector.load %arg7[%c4, %c0_30] : memref<8x8xf32, #tpu.memory_space<vmem>>, vector<1x8xf32>
    %56 = arith.maximumf %55, %28 : vector<1x8xf32>
    %c4_31 = arith.constant 4 : index
    %c0_32 = arith.constant 0 : index
    %57 = vector.load %arg7[%c4_31, %c0_32] : memref<8x8xf32, #tpu.memory_space<vmem>>, vector<1x8xf32>
    tpu.vector_store %arg7[%c4_31, %c0_32], %56 {strides = array<i32>} : memref<8x8xf32, #tpu.memory_space<vmem>>, vector<1x8xf32>,
    %c5 = arith.constant 5 : index
    %c0_33 = arith.constant 0 : index
    %58 = vector.load %arg7[%c5, %c0_33] : memref<8x8xf32, #tpu.memory_space<vmem>>, vector<1x8xf32>
    %59 = arith.minimumf %58, %30 : vector<1x8xf32>
    %c5_34 = arith.constant 5 : index
    %c0_35 = arith.constant 0 : index
    %60 = vector.load %arg7[%c5_34, %c0_35] : memref<8x8xf32, #tpu.memory_space<vmem>>, vector<1x8xf32>
    tpu.vector_store %arg7[%c5_34, %c0_35], %59 {strides = array<i32>} : memref<8x8xf32, #tpu.memory_space<vmem>>, vector<1x8xf32>,
    %c0_i32_36 = arith.constant 0 : i32
    %61 = arith.cmpi eq, %arg0, %c0_i32_36 : i32
    %62 = arith.extui %61 : i1 to i32
    %c0_i32_37 = arith.constant 0 : i32
    %63 = arith.cmpi ne, %62, %c0_i32_37 : i32
    scf.if %63 {
      %c0_38 = arith.constant 0 : index
      %c0_39 = arith.constant 0 : index
      %64 = vector.load %arg7[%c0_38, %c0_39] : memref<8x8xf32, #tpu.memory_space<vmem>>, vector<8x8xf32>
      %65 = vector.extract_strided_slice %64 {offsets = [0, 0], sizes = [1, 8], strides = [1, 1]} : vector<8x8xf32> to vector<1x8xf32>
      %66 = vector.shape_cast %65 : vector<1x8xf32> to vector<1x1x8xf32>
      %cst_40 = arith.constant dense<0.000000e+00> : vector<1xf32>
      %67 = vector.multi_reduction <add>, %66, %cst_40 [1, 2] : vector<1x1x8xf32> to vector<1xf32>
      %68 = vector.shape_cast %67 : vector<1xf32> to vector<1x1x1xf32>
      %69 = vector.extract %68[0, 0, 0] : f32 from vector<1x1x1xf32>
      %70 = vector.extract_strided_slice %64 {offsets = [1, 0], sizes = [1, 8], strides = [1, 1]} : vector<8x8xf32> to vector<1x8xf32>
      %71 = vector.shape_cast %70 : vector<1x8xf32> to vector<1x1x8xf32>
      %cst_41 = arith.constant dense<0.000000e+00> : vector<1xf32>
      %72 = vector.multi_reduction <add>, %71, %cst_41 [1, 2] : vector<1x1x8xf32> to vector<1xf32>
      %73 = vector.shape_cast %72 : vector<1xf32> to vector<1x1x1xf32>
      %74 = vector.extract %73[0, 0, 0] : f32 from vector<1x1x1xf32>
      %75 = vector.extract_strided_slice %64 {offsets = [2, 0], sizes = [1, 8], strides = [1, 1]} : vector<8x8xf32> to vector<1x8xf32>
      %76 = vector.shape_cast %75 : vector<1x8xf32> to vector<1x1x8xf32>
      %cst_42 = arith.constant dense<0.000000e+00> : vector<1xf32>
      %77 = vector.multi_reduction <add>, %76, %cst_42 [1, 2] : vector<1x1x8xf32> to vector<1xf32>
      %78 = vector.shape_cast %77 : vector<1xf32> to vector<1x1x1xf32>
      %79 = vector.extract %78[0, 0, 0] : f32 from vector<1x1x1xf32>
      %80 = vector.extract_strided_slice %64 {offsets = [3, 0], sizes = [1, 8], strides = [1, 1]} : vector<8x8xf32> to vector<1x8xf32>
      %81 = vector.shape_cast %80 : vector<1x8xf32> to vector<1x1x8xf32>
      %cst_43 = arith.constant dense<0.000000e+00> : vector<1xf32>
      %82 = vector.multi_reduction <add>, %81, %cst_43 [1, 2] : vector<1x1x8xf32> to vector<1xf32>
      %83 = vector.shape_cast %82 : vector<1xf32> to vector<1x1x1xf32>
      %84 = vector.extract %83[0, 0, 0] : f32 from vector<1x1x1xf32>
      %85 = vector.extract_strided_slice %64 {offsets = [4, 0], sizes = [1, 8], strides = [1, 1]} : vector<8x8xf32> to vector<1x8xf32>
      %86 = vector.shape_cast %85 : vector<1x8xf32> to vector<1x1x8xf32>
      %cst_44 = arith.constant dense<0xFF800000> : vector<1xf32>
      %87 = vector.multi_reduction <maximumf>, %86, %cst_44 [1, 2] : vector<1x1x8xf32> to vector<1xf32>
      %88 = vector.shape_cast %87 : vector<1xf32> to vector<1x1x1xf32>
      %89 = vector.extract %88[0, 0, 0] : f32 from vector<1x1x1xf32>
      %90 = vector.extract_strided_slice %64 {offsets = [5, 0], sizes = [1, 8], strides = [1, 1]} : vector<8x8xf32> to vector<1x8xf32>
      %91 = vector.shape_cast %90 : vector<1x8xf32> to vector<1x1x8xf32>
      %cst_45 = arith.constant dense<0x7F800000> : vector<1xf32>
      %92 = vector.multi_reduction <minimumf>, %91, %cst_45 [1, 2] : vector<1x1x8xf32> to vector<1xf32>
      %93 = vector.shape_cast %92 : vector<1xf32> to vector<1x1x1xf32>
      %94 = vector.extract %93[0, 0, 0] : f32 from vector<1x1x1xf32>
      %cst_46 = arith.constant 1.000000e+00 : f32
      %95 = arith.maximumf %74, %cst_46 : f32
      %96 = arith.divf %69, %95 : f32
      %cst_47 = arith.constant 1.000000e+00 : f32
      %97 = arith.maximumf %84, %cst_47 : f32
      %98 = arith.divf %79, %97 : f32
      %cst_48 = arith.constant 1.000000e+00 : f32
      %99 = arith.cmpf ogt, %74, %cst_48 : f32
      %100 = arith.select %99, %89, %98 : f32
      %cst_49 = arith.constant 1.000000e+00 : f32
      %101 = arith.cmpf ogt, %84, %cst_49 : f32
      %102 = arith.select %101, %94, %96 : f32
      %c0_50 = arith.constant 0 : index
      %c0_51 = arith.constant 0 : index
      %103 = vector.load %arg5[%c0_50, %c0_51] : memref<1x8xf32, #tpu.memory_space<vmem>>, vector<1x8xf32>
      %c0_52 = arith.constant 0 : index
      %c0_53 = arith.constant 0 : index
      %104 = vector.load %arg6[%c0_52, %c0_53] : memref<1x8xf32, #tpu.memory_space<vmem>>, vector<1x8xf32>
      %105 = vector.broadcast %102 : f32 to vector<1x8xf32>
      %106 = arith.cmpf ogt, %103, %105 : vector<1x8xf32>
      %107 = arith.mulf %103, %103 : vector<1x8xf32>
      %cst_54 = arith.constant 0.000000e+00 : f32
      %108 = vector.broadcast %cst_54 : f32 to vector<1x8xf32>
      %109 = arith.select %106, %107, %108 : vector<1x8xi1>, vector<1x8xf32>
      %110 = vector.shape_cast %109 : vector<1x8xf32> to vector<1x1x8xf32>
      %cst_55 = arith.constant dense<0.000000e+00> : vector<1xf32>
      %111 = vector.multi_reduction <add>, %110, %cst_55 [1, 2] : vector<1x1x8xf32> to vector<1xf32>
      %112 = vector.shape_cast %111 : vector<1xf32> to vector<1x1x1xf32>
      %113 = vector.extract %112[0, 0, 0] : f32 from vector<1x1x1xf32>
      %cst_56 = arith.constant 5.000000e-01 : f32
      %114 = vector.broadcast %cst_56 : f32 to vector<1x8xf32>
      %115 = arith.subf %114, %104 : vector<1x8xf32>
      %cst_57 = arith.constant 0.000000e+00 : f32
      %116 = vector.broadcast %cst_57 : f32 to vector<1x8xf32>
      %117 = arith.maximumf %115, %116 : vector<1x8xf32>
      %118 = vector.broadcast %100 : f32 to vector<1x8xf32>
      %119 = arith.cmpf olt, %104, %118 : vector<1x8xf32>
      %120 = arith.mulf %117, %117 : vector<1x8xf32>
      %cst_58 = arith.constant 0.000000e+00 : f32
      %121 = vector.broadcast %cst_58 : f32 to vector<1x8xf32>
      %122 = arith.select %119, %120, %121 : vector<1x8xi1>, vector<1x8xf32>
      %123 = vector.shape_cast %122 : vector<1x8xf32> to vector<1x1x8xf32>
      %cst_59 = arith.constant dense<0.000000e+00> : vector<1xf32>
      %124 = vector.multi_reduction <add>, %123, %cst_59 [1, 2] : vector<1x1x8xf32> to vector<1xf32>
      %125 = vector.shape_cast %124 : vector<1xf32> to vector<1x1x1xf32>
      %126 = vector.extract %125[0, 0, 0] : f32 from vector<1x1x1xf32>
      %127 = arith.addf %113, %126 : f32
      %c0_60 = arith.constant 0 : index
      %c0_61 = arith.constant 0 : index
      %128 = memref.load %arg4[%c0_60, %c0_61] : memref<1x1xf32, #tpu.memory_space<smem>>
      memref.store %127, %arg4[%c0_60, %c0_61] : memref<1x1xf32, #tpu.memory_space<smem>>
    } else {
    }
    return
  }
  func.func @transform_0(%arg0: i32) -> (i32, i32) {
    %c0_i32 = arith.constant 0 : i32
    %c0_i32_0 = arith.constant 0 : i32
    return %arg0, %c0_i32 : i32, i32
  }
  func.func @transform_1(%arg0: i32) -> (i32, i32) {
    %c0_i32 = arith.constant 0 : i32
    %c0_i32_0 = arith.constant 0 : i32
    return %arg0, %c0_i32 : i32, i32
  }
  func.func @transform_2(%arg0: i32) -> (i32, i32) {
    %c0_i32 = arith.constant 0 : i32
    %c0_i32_0 = arith.constant 0 : i32
    %c0_i32_1 = arith.constant 0 : i32
    return %c0_i32, %c0_i32_0 : i32, i32
  }
  func.func @transform_3(%arg0: i32) -> (i32, i32) {
    %c0_i32 = arith.constant 0 : i32
    %c0_i32_0 = arith.constant 0 : i32
    %c0_i32_1 = arith.constant 0 : i32
    return %c0_i32, %c0_i32_0 : i32, i32
  }
}

</mosaic_0001>

<bundles_post_ra>
// kernel: tpu_custom_call.1
= control target key start
LH: loop header
LB: loop body
LE: loop exit
PB: predicated region body
PF: predicated region fallthrough
CT: control target
= control target key end

     0   :  { %8 = vsyncpa [#allocation6], 0  ;;  %s628_s0 = inlined_call_operand.hbm [shape: f32[8,32], index: 0, kind: input, shape index: {}]   ;;  %s629_s1 = inlined_call_operand.hbm [shape: f32[8,32], index: 1, kind: input, shape index: {}]   ;;  %s630_s2 = inlined_call_operand.vmem [shape: s32[1,8], index: 2, kind: input, shape index: {}]   ;;  %s631_s3 = inlined_call_operand.hbm [shape: f32[1,1], index: 3, kind: output, shape index: {}]  }
   0x1   :  { %9 = vsyncpa [#allocation9], 0 }
   0x2   :  { %10 = vsyncpa [#allocation7], 0  ;;  %s509_s12 = smov [#allocation5]   ;;  %s510_s14 = smov [#allocation8]  }
   0x3   :  { %s17_s13 = sshll.u32 %s509_s12, 4  ;;  %s27_s15 = sshll.u32 %s510_s14, 4  ;;  %s18_s13 = int_to_ptr.vmem [resolvable:$true] %s17_s13  ;;  %s28_s15 = int_to_ptr.vmem [resolvable:$true] %s27_s15 }
   0x4   :  { %s449_s18 = scalar_lea.hbm %s628_s0, 128 }
   0x5   :  { %p450_p0 = scmp.ne.s32.totalorder %s628_s0, %s449_s18  ;;  %p453_p1 = scmp.lt.u32.totalorder %s449_s18, %s628_s0 }
   0x7   :  { %p455_p2 = pnand %p453_p1, %p450_p0 }
   0x9   :  { %458 = shalt.err (!%p455_p2)
}
   0xa   :  { %s459_s23 = scalar_lea.vmem %s18_s13, 128  ;;  %p464_p4 = scmp.lt.s32.totalorder %s18_s13, %s18_s13 }
   0xb   :  { %p460_p3 = scmp.ne.s32.totalorder %s18_s13, %s459_s23  ;;  %p465_p5 = scmp.lt.s32.totalorder %s459_s23, %s459_s23 }
   0xd   :  { %p466_p6 = por %p465_p5, %p464_p4 }
   0xf   :  { %p467_p7 = pnand %p466_p6, %p460_p3 }
  0x11   :  { %470 = shalt.err (!%p467_p7)
}
  0x12   :  { %20 = dma.hbm_to_vmem [thread:$0]  %s628_s0, 128, %s18_s13, [#allocation6]  }
  0x13   :  { %s471_s28 = scalar_lea.hbm %s629_s1, 128 }
  0x14   :  { %p472_p8 = scmp.ne.s32.totalorder %s629_s1, %s471_s28  ;;  %p475_p9 = scmp.lt.u32.totalorder %s471_s28, %s629_s1 }
  0x16   :  { %p477_p10 = pnand %p475_p9, %p472_p8 }
  0x18   :  { %480 = shalt.err (!%p477_p10)
}
  0x19   :  { %s481_s6 = scalar_lea.vmem %s28_s15, 128  ;;  %p486_p12 = scmp.lt.s32.totalorder %s28_s15, %s28_s15 }
  0x1a   :  { %p482_p11 = scmp.ne.s32.totalorder %s28_s15, %s481_s6  ;;  %p487_p13 = scmp.lt.s32.totalorder %s481_s6, %s481_s6 }
  0x1c   :  { %p488_p0 = por %p487_p13, %p486_p12 }
  0x1e   :  { %p489_p1 = pnand %p488_p0, %p482_p11 }
  0x20   :  { %492 = shalt.err (!%p489_p1)
}
  0x21   :  { %30 = dma.hbm_to_vmem [thread:$0]  %s629_s1, 128, %s28_s15, [#allocation9]  }
  0x22   :  { %503 = dma.done.wait [#allocation6], 128  }
  0x23   :  { %504 = vsyncadd [#allocation6], 4294967168 }
  0x24   :  { %505 = dma.done.wait [#allocation9], 128  }
  0x25   :  { %506 = vsyncadd [#allocation9], 4294967168  ;;  %v48_v0 = vld [vmem:[#allocation5] sm:$0xff]  ;;  %vm51_vm0 = vcmask 261120   ;;  %v49_v1 = vld [vmem:[#allocation8] sm:$0xff]  ;;  %v511_v8 = vmov 0   ;;  %v73_v9 = vlaneseq }
  0x26   :  { %v55_v2 = vmul.f32 %v48_v0, %v48_v0  ;;  %v59_v3 = vmul.f32 %v49_v1, %v49_v1  ;;  %v50_v4 = vmul.f32 %v49_v1, %v48_v0  ;;  %442 = vset.pattern.permute.xlu0 %v511_v8  ;;  %441 = vset.pattern.permute.xlu1 %v511_v8  ;;  %vm43_vm1 = vcmask 64512   ;;  %v69_v58 = vld [vmem:[%s630_s2] sm:$0x1]  ;;  %s516_s10 = smov 1.0   ;;  %s493_s26 = scalar_lea.hbm %s631_s3, 16 }
  0x27   :  { %vm45_vm2 = vcmask 57344   ;;  %v74_v10 = vshrl.u32 %v73_v9, 7  ;;  %v158_v11 = vand.u32 127, %v73_v9  ;;  %v512_v12 = vmov 0.0   ;;  %p494_p4 = scmp.ne.s32.totalorder %s631_s3, %s493_s26  ;;  %p497_p5 = scmp.lt.u32.totalorder %s493_s26, %s631_s3 }
  0x28   :  { %v56_v5 = vsel %vm51_vm0, %v55_v2, 0.0  ;;  %v52_v6 = vsel %vm51_vm0, %v50_v4, 0.0  ;;  %v60_v7 = vsel %vm51_vm0, %v59_v3, 0.0  ;;  %44 = vst.msk [vmem:[#allocation4] sm:$0xff] %vm43_vm1, %v512_v12  ;;  %v513_v13 = vmov inf  }
  0x29   :  { %57 = vadd.xlane.f32.xlu0 %v56_v5  ;;  %53 = vadd.xlane.f32.xlu1 %v52_v6  ;;  %47 = vst.msk [vmem:[#allocation4 + $0x5] sm:$0x1] %vm45_vm2, %v513_v13  ;;  %v563_v14 = vsub.s32 %v158_v11, %v74_v10  ;;  %v514_v20 = vmov 1966171168   ;;  %v75_v24 = vsub.s32 0, %v74_v10  ;;  %v79_v27 = vsub.s32 1, %v74_v10  ;;  %p499_p6 = pnand %p497_p5, %p494_p4 }
  0x2a   :  { %v110_v21 = vunpack.c.l.s4 %v514_v20  ;;  %v83_v28 = vsub.s32 2, %v74_v10  ;;  %v87_v29 = vsub.s32 3, %v74_v10  ;;  %v91_v30 = vsub.s32 4, %v74_v10 }
  0x2b   :  { %v95_v31 = vsub.s32 5, %v74_v10  ;;  %v99_v32 = vsub.s32 6, %v74_v10  ;;  %v103_v33 = vsub.s32 7, %v74_v10  ;;  %v515_v57 = vmov -inf  }
  0x2c   :  { %v111_v25 = vunpack.c.0.s8 %v110_v21  ;;  %46 = vst.msk [vmem:[#allocation4 + $0x4] sm:$0x1] %vm45_vm2, %v515_v57  ;;  %vm71_vm3 = vcmp.eq.s32.totalorder %v69_v58, 0  ;;  %vm70_vm4 = vcmp.eq.s32.totalorder %v69_v58, 1  ;;  %vm324_vm5 = vcmask 61444  }
  0x2d   :  { %61 = vadd.xlane.f32.xlu0 %v60_v7  ;;  %v411_v59 = vsel %vm71_vm3, 1.0, %v512_v12  ;;  %v410_v62 = vsel %vm70_vm4, 1.0, %v512_v12  ;;  %vm335_vm6 = vcmask 62469  }
  0x2e   :  { %v565_v35 = vsub.s32 %v111_v25, %v74_v10 }
  0x2f   :  { %v262_v60 = vld [vmem:[#allocation4 + $0x3] sm:$0x1]  ;;  %v231_v63 = vld [vmem:[#allocation4 + $0x1] sm:$0x1]  ;;  %v205_v20 = vld [vmem:[#allocation4] sm:$0x1] }
  0x30   :  { %v265_v61 = vadd.f32 %v411_v59, %v262_v60  ;;  %v234_v0 = vadd.f32 %v410_v62, %v231_v63  ;;  %v270_v9 = vld [vmem:[#allocation4 + $0x5] sm:$0x1] }
  0x32   :  { %266 = vst.msk [vmem:[#allocation4 + $0x3] sm:$0x1] %vm45_vm2, %v265_v61  ;;  %235 = vst.msk [vmem:[#allocation4 + $0x1] sm:$0x1] %vm45_vm2, %v234_v0 }
  0x33   :  { %v267_v11 = vld [vmem:[#allocation4 + $0x4] sm:$0x1] }
  0xb6   :  { %v58_v15 = vpop.xlane.xlu0 %57  ;;  %v54_v22 = vpop.xlane.xlu1 %53 }
  0xb7   :  { %v63_v17 = vmax.f32 %v58_v15, 1e-16 }
  0xba   :  { %v62_v16 = vpop.xlane.xlu0 %61 }
  0xbb   :  { %v64_v18 = vmax.f32 %v62_v16, 1e-16 }
  0xbd   :  { %v65_v19 = vmul.f32 %v64_v18, %v63_v17 }
  0xbf   :  { %443 = vrsqrt.f32 %v65_v19 }
  0xc9   :  { %v444_v23 = vpop.eup %443 }
  0xca   :  { %v67_v26 = vmul.f32 %v444_v23, %v54_v22 }
  0xcc   :  { %v68_v34 = vsub.f32 1.0, %v67_v26  ;;  %v236_v26 = vld [vmem:[#allocation4 + $0x2] sm:$0x1] }
  0xce   :  { %v76_v36 = vrot.slane %v68_v34, %v75_v24  ;;  %v80_v37 = vrot.slane %v68_v34, %v79_v27  ;;  %v84_v38 = vrot.slane %v68_v34, %v83_v28  ;;  %v88_v39 = vrot.slane %v68_v34, %v87_v29 }
  0xcf   :  { %v92_v40 = vrot.slane %v68_v34, %v91_v30  ;;  %v96_v41 = vrot.slane %v68_v34, %v95_v31  ;;  %v100_v42 = vrot.slane %v68_v34, %v99_v32  ;;  %v104_v43 = vrot.slane %v68_v34, %v103_v33 }
  0xd0   :  { %v105_v44 = vcombine.low %v76_v36, %v80_v37  ;;  %v106_v45 = vcombine.low %v84_v38, %v88_v39 }
  0xd1   :  { %v107_v46 = vcombine.low %v92_v40, %v96_v41  ;;  %v108_v47 = vcombine.low %v100_v42, %v104_v43 }
  0xd2   :  { %v115_v48 = vrot.slane %v105_v44, %v565_v35  ;;  %v122_v49 = vrot.slane %v106_v45, %v565_v35 }
  0xd3   :  { %v129_v50 = vrot.slane %v107_v46, %v565_v35  ;;  %v136_v51 = vrot.slane %v108_v47, %v565_v35 }
  0xd4   :  { %v137_v52 = vcombine.low %v115_v48, %v122_v49 }
  0xd5   :  { %v138_v53 = vcombine.low %v129_v50, %v136_v51 }
  0xd6   :  { %v145_v54 = vrot.slane %v137_v52, %v565_v35 }
  0xd7   :  { %v152_v55 = vrot.slane %v138_v53, %v565_v35 }
  0xd9   :  { %v153_v56 = vcombine.low %v145_v54, %v152_v55 }
  0xdb   :  { %180 = vperm.xlu0 %442, %v153_v56   ;;  %155 = vperm.xlu1 %441, %v153_v56  }
  0xdf   :  { %207 = vperm.xlu1 %441, %v153_v56  }
  0xe3   :  { %238 = vperm.xlu1 %441, %v153_v56  }
 0x15a   :  { %v181_v1 = vpop.permute.xlu0 %180  ;;  %v156_v2 = vpop.permute.xlu1 %155 }
 0x15b   :  { %v185_v3 = vrot.slane %v181_v1, %v563_v14  ;;  %v162_v4 = vrot.slane %v156_v2, %v563_v14 }
 0x15d   :  { %v192_v5 = vrot.slane %v185_v3, %v565_v35  ;;  %v169_v6 = vrot.slane %v162_v4, %v565_v35 }
 0x15e   :  { %v208_v7 = vpop.permute.xlu1 %207 }
 0x15f   :  { %v199_v8 = vrot.slane %v192_v5, %v565_v35  ;;  %v176_v10 = vrot.slane %v169_v6, %v565_v35  ;;  %v212_v12 = vrot.slane %v208_v7, %v563_v14 }
 0x161   :  { %v201_v13 = vsel %vm71_vm3, %v199_v8, inf  ;;  %v178_v15 = vsel %vm70_vm4, %v176_v10, -inf  ;;  %v219_v16 = vrot.slane %v212_v12, %v565_v35 }
 0x162   :  { %204 = vst.msk [vmem:[#allocation3] sm:$0x1] %vm45_vm2, %v201_v13  ;;  %v271_v17 = vmin.f32 %v270_v9, %v201_v13  ;;  %203 = vst.msk [vmem:[#allocation2] sm:$0x1] %vm45_vm2, %v178_v15  ;;  %v268_v18 = vmax.f32 %v267_v11, %v178_v15  ;;  %v239_v19 = vpop.permute.xlu1 %238 }
 0x163   :  { %v226_v21 = vrot.slane %v219_v16, %v565_v35  ;;  %v243_v22 = vrot.slane %v239_v19, %v563_v14 }
 0x164   :  { %272 = vst.msk [vmem:[#allocation4 + $0x5] sm:$0x1] %vm45_vm2, %v271_v17  ;;  %269 = vst.msk [vmem:[#allocation4 + $0x4] sm:$0x1] %vm45_vm2, %v268_v18 }
 0x165   :  { %v228_v23 = vsel %vm70_vm4, %v226_v21, 0.0  ;;  %v250_v24 = vrot.slane %v243_v22, %v565_v35 }
 0x166   :  { %v229_v25 = vadd.f32 %v228_v23, %v205_v20 }
 0x167   :  { %v257_v27 = vrot.slane %v250_v24, %v565_v35 }
 0x168   :  { %230 = vst.msk [vmem:[#allocation4] sm:$0x1] %vm45_vm2, %v229_v25 }
 0x169   :  { %v259_v28 = vsel %vm71_vm3, %v257_v27, 0.0  ;;  %v361_v22 = vld [vmem:[#allocation3] sm:$0x1]  ;;  %v360_v23 = vld [vmem:[#allocation2] sm:$0x1] }
 0x16a   :  { %v260_v29 = vadd.f32 %v259_v28, %v236_v26  ;;  %v376_v24 = vsub.f32 0.5, %v361_v22  ;;  %v364_v26 = vmul.f32 %v360_v23, %v360_v23 }
 0x16c   :  { %261 = vst.msk [vmem:[#allocation4 + $0x2] sm:$0x1] %vm45_vm2, %v260_v29  ;;  %v377_v28 = vmax.f32 %v376_v24, 0.0 }
 0x173   :  { %v276_v14 = vld [vmem:[#allocation4] sm:$0xff] }
 0x174   :  { %v277_v30 = vsel %vm45_vm2, %v276_v14, 0.0  ;;  %v288_v31 = vrot.slane %v276_v14, 1  ;;  %v300_v32 = vrot.slane %v276_v14, 2  ;;  %v312_v36 = vrot.slane %v276_v14, 3 }
 0x175   :  { %278 = vadd.xlane.f32.xlu1 %v277_v30  ;;  %v325_v37 = vsel %vm324_vm5, %v276_v14, -inf  ;;  %v336_v38 = vsel %vm335_vm6, %v276_v14, inf  ;;  %v380_v30 = vmul.f32 %v377_v28, %v377_v28 }
 0x176   :  { %v290_v33 = vsel %vm45_vm2, %v288_v31, 0.0  ;;  %v302_v34 = vsel %vm45_vm2, %v300_v32, 0.0  ;;  %v314_v35 = vsel %vm45_vm2, %v312_v36, 0.0 }
 0x177   :  { %291 = vadd.xlane.f32.xlu0 %v290_v33 }
 0x179   :  { %303 = vadd.xlane.f32.xlu1 %v302_v34 }
 0x17d   :  { %315 = vadd.xlane.f32.xlu1 %v314_v35 }
 0x181   :  { %326 = vmax.xlane.f32.xlu1 %v325_v37 }
 0x185   :  { %337 = vmin.xlane.f32.xlu1 %v336_v38 }
 0x202   :  { %v279_v39 = vpop.xlane.xlu1 %278 }
 0x203   :  { %v280_v40 = vrot.slane %v279_v39, 4 }
 0x204   :  { %v292_v41 = vpop.xlane.xlu0 %291 }
 0x205   :  { %v281_v42 = vadd.f32 %v280_v40, %v279_v39  ;;  %v293_v43 = vrot.slane %v292_v41, 4 }
 0x206   :  { %v304_v44 = vpop.xlane.xlu1 %303 }
 0x207   :  { %v282_v45 = vrot.slane %v281_v42, 2  ;;  %v294_v46 = vadd.f32 %v293_v43, %v292_v41  ;;  %v305_v47 = vrot.slane %v304_v44, 4 }
 0x209   :  { %v295_v48 = vrot.slane %v294_v46, 2  ;;  %v306_v49 = vadd.f32 %v305_v47, %v304_v44  ;;  %v283_v50 = vadd.f32 %v282_v45, %v281_v42 }
 0x20a   :  { %v316_v51 = vpop.xlane.xlu1 %315 }
 0x20b   :  { %v307_v52 = vrot.slane %v306_v49, 2  ;;  %v317_v53 = vrot.slane %v316_v51, 4  ;;  %v284_v54 = vrot.slane %v283_v50, 1  ;;  %v296_v55 = vadd.f32 %v295_v48, %v294_v46 }
 0x20d   :  { %v318_v56 = vadd.f32 %v317_v53, %v316_v51  ;;  %v285_v57 = vadd.f32 %v284_v54, %v283_v50  ;;  %v297_v58 = vrot.slane %v296_v55, 1  ;;  %v308_v59 = vadd.f32 %v307_v52, %v306_v49 }
 0x20e   :  { %v327_v60 = vpop.xlane.xlu1 %326 }
 0x20f   :  { %v319_v61 = vrot.slane %v318_v56, 2  ;;  %v328_v62 = vrot.slane %v327_v60, 4  ;;  %412 = vpush %v285_v57  ;;  %v298_v63 = vadd.f32 %v297_v58, %v296_v55  ;;  %v309_v0 = vrot.slane %v308_v59, 1 }
 0x211   :  { %v329_v1 = vmax.f32 %v327_v60, %v328_v62  ;;  %414 = vpush %v298_v63  ;;  %v310_v2 = vadd.f32 %v309_v0, %v308_v59  ;;  %v320_v3 = vadd.f32 %v319_v61, %v318_v56 }
 0x212   :  { %v338_v4 = vpop.xlane.xlu1 %337 }
 0x213   :  { %v330_v5 = vrot.slane %v329_v1, 2  ;;  %v339_v6 = vrot.slane %v338_v4, 4  ;;  %416 = vpush %v310_v2  ;;  %v321_v7 = vrot.slane %v320_v3, 1 }
 0x215   :  { %v340_v8 = vmin.f32 %v338_v4, %v339_v6  ;;  %v322_v9 = vadd.f32 %v321_v7, %v320_v3  ;;  %v331_v10 = vmax.f32 %v329_v1, %v330_v5 }
 0x217   :  { %v341_v11 = vrot.slane %v340_v8, 2  ;;  %418 = vpush %v322_v9  ;;  %v332_v12 = vrot.slane %v331_v10, 1 }
 0x219   :  { %v333_v13 = vmax.f32 %v331_v10, %v332_v12  ;;  %v342_v15 = vmin.f32 %v340_v8, %v341_v11 }
 0x21b   :  { %420 = vpush %v333_v13  ;;  %v343_v16 = vrot.slane %v342_v15, 1 }
 0x21d   :  { %v344_v17 = vmin.f32 %v342_v15, %v343_v16 }
 0x21f   :  { %422 = vpush %v344_v17 }
 0x240   :  { %s413_s2 = spop %412 }
 0x242   :  { %s607_s9 = spop %414 }
 0x243   :  { %s346_s11 = smax.f32 %s516_s10, %s607_s9  ;;  %p356_p3 = scmp.gt.f32.partialorder %s607_s9, 1.0 }
 0x244   :  { %v347_v18 = vstv %s346_s11  ;;  %s610_s12 = spop %416 }
 0x245   :  { %445 = vrcp.f32 %v347_v18 }
 0x248   :  { %s419_s13 = spop %418 }
 0x249   :  { %s351_s14 = smax.f32 %s516_s10, %s419_s13  ;;  %p358_p2 = scmp.gt.f32.partialorder %s419_s13, 1.0 }
 0x24a   :  { %v352_v19 = vstv %s351_s14 }
 0x24b   :  { %447 = vrcp.f32 %v352_v19 }
 0x24c   :  { %s421_s15 = spop %420 }
 0x24f   :  { %v446_v20 = vpop.eup %445 }
 0x250   :  { %424 = vpush %v446_v20  ;;  %s423_s16 = spop %422 }
 0x255   :  { %v448_v21 = vpop.eup %447 }
 0x256   :  { %426 = vpush %v448_v21 }
 0x281   :  { %s425_s17 = spop %424 }
 0x282   :  { %s350_s18 = smul.f32 %s425_s17, %s413_s2 }
 0x284   :  { %s633_s16 = smov (!%p358_p2, %s423_s16), %s350_s18 }
 0x285   :  { %v362_v25 = vstv %s633_s16 }
 0x286   :  { %vm363_vm7 = vcmp.gt.f32.partialorder %v360_v23, %v362_v25 }
 0x287   :  { %s427_s19 = spop %426  ;;  %v365_v27 = vsel %vm363_vm7, %v364_v26, 0.0 }
 0x288   :  { %s355_s20 = smul.f32 %s427_s19, %s610_s12  ;;  %v366_v29 = vsel %vm45_vm2, %v365_v27, 0.0 }
 0x289   :  { %367 = vadd.xlane.f32.xlu1 %v366_v29 }
 0x28a   :  { %s635_s15 = smov (!%p356_p3, %s421_s15), %s355_s20 }
 0x28b   :  { %v378_v14 = vstv %s635_s15 }
 0x28c   :  { %vm379_vm8 = vcmp.lt.f32.partialorder %v361_v22, %v378_v14 }
 0x28d   :  { %v381_v31 = vsel %vm379_vm8, %v380_v30, 0.0 }
 0x28e   :  { %v382_v32 = vsel %vm45_vm2, %v381_v31, 0.0 }
 0x28f   :  { %383 = vadd.xlane.f32.xlu0 %v382_v32 }
 0x316   :  { %v368_v33 = vpop.xlane.xlu1 %367 }
 0x317   :  { %v369_v34 = vrot.slane %v368_v33, 4 }
 0x319   :  { %v370_v36 = vadd.f32 %v369_v34, %v368_v33 }
 0x31b   :  { %v371_v35 = vrot.slane %v370_v36, 2 }
 0x31c   :  { %v384_v37 = vpop.xlane.xlu0 %383 }
 0x31d   :  { %v372_v38 = vadd.f32 %v371_v35, %v370_v36  ;;  %v385_v39 = vrot.slane %v384_v37, 4 }
 0x31f   :  { %v386_v40 = vadd.f32 %v385_v39, %v384_v37  ;;  %v373_v41 = vrot.slane %v372_v38, 1 }
 0x321   :  { %v387_v42 = vrot.slane %v386_v40, 2  ;;  %v374_v43 = vadd.f32 %v373_v41, %v372_v38 }
 0x323   :  { %v388_v44 = vadd.f32 %v387_v42, %v386_v40  ;;  %428 = vpush %v374_v43 }
 0x325   :  { %v389_v45 = vrot.slane %v388_v44, 1 }
 0x327   :  { %v390_v46 = vadd.f32 %v389_v45, %v388_v44 }
 0x329   :  { %430 = vpush %v390_v46 }
 0x354   :  { %s429_s21 = spop %428 }
 0x35a   :  { %s431_s22 = spop %430 }
 0x35b   :  { %s392_s23 = sadd.f32 %s431_s22, %s429_s21 }
 0x35d   :  { %394 = sst [smem:[#allocation10]] %s392_s23 }
 0x35e   :  { %502 = shalt.err (!%p499_p6)
}
 0x35f   :  { %s517_s4 = smov [#allocation10]  }
 0x360   :  { %402 = dma.smem_to_hbm %s517_s4, 16, %s631_s3, [#allocation7]  }
 0x361   :  { %507 = dma.done.wait [#allocation7], 16  }
 0x362   :  { %508 = vsyncadd [#allocation7], 4294967280 }
 0x363   :  { %406 = sfence }
 0x364   :  { %407 = vsyncpa [#allocation6], 1 }
 0x365   :  { %408 = vsyncpa [#allocation9], 1 }
 0x366   :  { %409 = vsyncpa [#allocation7], 1 }

</bundles_post_ra>
